<compile_context>
chip_gen: v5e
topology: v5e:2x2
jax: 0.10.0
libtpu: 0.0.40
codegen_flags: <defaults>
</compile_context>

<pallas_src>
import jax
import jax.numpy as jnp
from jax.experimental import pallas as pl
from jax.experimental.pallas import tpu as pltpu


def decoder_seq_kernel(tok_ref, emb_ref, h0_ref, wih_ref, bih_ref, whh_ref,
                       bhh_ref, wout_ref, bout_ref, logp_ref, h_ref):
    t = pl.program_id(0)
    H = h_ref.shape[1]
    V = emb_ref.shape[0]

    # Seed the carried hidden state (resident output block) on the first step.
    @pl.when(t == 0)
    def _():
        h_ref[...] = h0_ref[...]

    # ---- embedding gather + ReLU ------------------------------------------
    # One-hot MXU gather: exact row copy of the bf16 table (1.0 * value with
    # f32 accumulation), avoids dynamic sublane slicing.  At V=128 this is a
    # single MXU push.
    # TODO(synk): for realistic vocab sizes gather the embedding row via a
    # pl.Element index_map / manual DMA instead of keeping the table resident.
    tok = tok_ref[t]
    onehot = (jax.lax.broadcasted_iota(jnp.int32, (1, V), 1) == tok)
    x = jnp.dot(onehot.astype(jnp.bfloat16), emb_ref[...],
                preferred_element_type=jnp.float32)
    x = jnp.maximum(x, 0.0)                                  # relu, f32

    # ---- GRU single step (PyTorch gate order r, z, n) ----------------------
    h = h_ref[...]                                           # f32 carry
    gi = jnp.dot(x.astype(jnp.bfloat16), wih_ref[...],
                 preferred_element_type=jnp.float32) + bih_ref[...]
    gh = jnp.dot(h.astype(jnp.bfloat16), whh_ref[...],
                 preferred_element_type=jnp.float32) + bhh_ref[...]
    r = jax.nn.sigmoid(gi[:, 0:H] + gh[:, 0:H])
    z = jax.nn.sigmoid(gi[:, H:2 * H] + gh[:, H:2 * H])
    n = jnp.tanh(gi[:, 2 * H:3 * H] + r * gh[:, 2 * H:3 * H])
    h_new = (1.0 - z) * n + z * h
    h_ref[...] = h_new

    # ---- output projection + numerically-stable log_softmax ----------------
    logits = jnp.dot(h_new.astype(jnp.bfloat16), wout_ref[...],
                     preferred_element_type=jnp.float32) + bout_ref[...]
    m = jnp.max(logits, axis=-1, keepdims=True)
    shifted = logits - m
    lse = jnp.log(jnp.sum(jnp.exp(shifted), axis=-1, keepdims=True))
    logp_ref[...] = (shifted - lse).reshape(logp_ref.shape)


def decoder_rnn_decode(tokens, hidden, params):
    """Run the decoder for a whole token sequence inside one kernel.

    tokens: (T,) int32 token ids; hidden: (1, 1, H) initial hidden state.
    Returns ((T, V) per-step log-probs, (1, 1, H) final hidden state).
    Semantically identical to calling DecoderRNN.forward T times.
    """
    emb = params["embedding"]
    V, H = emb.shape
    T = int(tokens.shape[0])
    tokens = tokens.astype(jnp.int32)
    h0 = hidden.reshape(1, H).astype(jnp.float32)

    grid_spec = pltpu.PrefetchScalarGridSpec(
        num_scalar_prefetch=1,                                 # token ids -> SMEM
        grid=(T,),
        in_specs=[
            pl.BlockSpec((V, H), lambda t, tok: (0, 0)),       # embedding (resident)
            pl.BlockSpec((1, H), lambda t, tok: (0, 0)),       # initial hidden
            pl.BlockSpec((H, 3 * H), lambda t, tok: (0, 0)),   # W_ih^T (resident)
            pl.BlockSpec((1, 3 * H), lambda t, tok: (0, 0)),   # b_ih
            pl.BlockSpec((H, 3 * H), lambda t, tok: (0, 0)),   # W_hh^T (resident)
            pl.BlockSpec((1, 3 * H), lambda t, tok: (0, 0)),   # b_hh
            pl.BlockSpec((H, V), lambda t, tok: (0, 0)),       # W_out^T (resident)
            pl.BlockSpec((1, V), lambda t, tok: (0, 0)),       # b_out
        ],
        out_specs=(
            pl.BlockSpec((1, 1, V), lambda t, tok: (t, 0, 0)),  # per-step log-probs
            pl.BlockSpec((1, H), lambda t, tok: (0, 0)),        # carried hidden state
        ),
    )

    logp, h_final = pl.pallas_call(
        decoder_seq_kernel,
        grid_spec=grid_spec,
        out_shape=(jax.ShapeDtypeStruct((T, 1, V), jnp.float32),
                   jax.ShapeDtypeStruct((1, H), jnp.float32)),
        compiler_params=pltpu.CompilerParams(
            # Step t+1 depends on step t through the resident hidden block.
            dimension_semantics=("arbitrary",)),
    )(tokens, emb, h0,
      params["w_ih_t"], params["b_ih"],
      params["w_hh_t"], params["b_hh"],
      params["w_out_t"], params["b_out"])

    return logp.reshape(T, V), h_final.reshape(1, 1, H)


def decoder_rnn_forward(token, hidden, params):
    """Single-step API parity with DecoderRNN.forward(input, hidden)."""
    logp, h = decoder_rnn_decode(jnp.asarray([token], dtype=jnp.int32),
                                 hidden, params)
    return logp, h                                            # (1, V), (1, 1, H)


def decoder_rnn_reference(tokens, hidden, params):
    """Pure-JAX reference with the same bf16 weights / f32 accumulation."""
    H = params["w_hh_t"].shape[0]
    h = hidden.reshape(1, H).astype(jnp.float32)
    outs = []
    for t in range(int(tokens.shape[0])):
        tok = tokens[t]
        x = jnp.maximum(params["embedding"][tok].astype(jnp.float32),
                        0.0).reshape(1, H)
        gi = jnp.dot(x.astype(jnp.bfloat16), params["w_ih_t"],
                     preferred_element_type=jnp.float32) + params["b_ih"]
        gh = jnp.dot(h.astype(jnp.bfloat16), params["w_hh_t"],
                     preferred_element_type=jnp.float32) + params["b_hh"]
        r = jax.nn.sigmoid(gi[:, 0:H] + gh[:, 0:H])
        z = jax.nn.sigmoid(gi[:, H:2 * H] + gh[:, H:2 * H])
        n = jnp.tanh(gi[:, 2 * H:3 * H] + r * gh[:, 2 * H:3 * H])
        h = (1.0 - z) * n + z * h
        logits = jnp.dot(h.astype(jnp.bfloat16), params["w_out_t"],
                         preferred_element_type=jnp.float32) + params["b_out"]
        outs.append(jax.nn.log_softmax(logits, axis=-1))
    return jnp.concatenate(outs, axis=0), h.reshape(1, 1, H)


def init_params(key, hidden_size, output_size):
    """Deterministic synthetic params matching the PyTorch module shapes."""
    H, V = hidden_size, output_size
    k = 1.0 / jnp.sqrt(jnp.float32(H))
    keys = jax.random.split(key, 7)
    u = lambda kk, shape: jax.random.uniform(kk, shape, jnp.float32, -k, k)
    return {
        # nn.Embedding(V, H) ~ N(0, 1); stored bf16 (weight-only quantization).
        "embedding": jax.random.normal(keys[0], (V, H), jnp.float32).astype(jnp.bfloat16),
        # nn.GRU weight_ih/hh are (3H, H) — stored transposed (H, 3H), bf16.
        "w_ih_t": u(keys[1], (H, 3 * H)).astype(jnp.bfloat16),
        "b_ih": u(keys[2], (1, 3 * H)),
        "w_hh_t": u(keys[3], (H, 3 * H)).astype(jnp.bfloat16),
        "b_hh": u(keys[4], (1, 3 * H)),
        # nn.Linear(H, V) weight is (V, H) — stored transposed (H, V), bf16.
        "w_out_t": u(keys[5], (H, V)).astype(jnp.bfloat16),
        "b_out": u(keys[6], (1, V)),
    }


if __name__ == "__main__":
    hidden_size = 32
    output_size = 128   # vocab size
    seq_len = 8

    key = jax.random.PRNGKey(0)
    pkey, tkey = jax.random.split(key, 2)
    params = init_params(pkey, hidden_size, output_size)

    tokens = jax.random.randint(tkey, (seq_len,), 0, output_size, jnp.int32)
    hidden = jnp.zeros((1, 1, hidden_size), jnp.float32)      # initHidden()

    log_probs, new_hidden = decoder_rnn_decode(tokens, hidden, params)
    jax.block_until_ready((log_probs, new_hidden))

    # Shape + log_softmax sanity: per-step probabilities sum to ~1.
    assert log_probs.shape == (seq_len, output_size)
    assert new_hidden.shape == (1, 1, hidden_size)
    assert jnp.allclose(jnp.sum(jnp.exp(log_probs), axis=-1), 1.0, atol=1e-3)

    # Pure-JAX reference (same bf16 weights / f32 accumulation).
    ref_logp, ref_h = decoder_rnn_reference(tokens, hidden, params)
    assert float(jnp.max(jnp.abs(log_probs - ref_logp))) < 1e-2
    assert float(jnp.max(jnp.abs(new_hidden - ref_h))) < 1e-2

    # Single-step API parity with DecoderRNN.forward(input, hidden).
    lp1, h1 = decoder_rnn_forward(int(tokens[0]), hidden, params)
    jax.block_until_ready((lp1, h1))
    assert lp1.shape == (1, output_size) and h1.shape == (1, 1, hidden_size)

    print("KERNEL_OK")
</pallas_src>

<mosaic_0001>
module attributes {stable_mosaic.version = 11 : i64} {
  func.func @decoder_seq_kernel(%arg0: i32, %arg1: memref<8xi32, #tpu.memory_space<smem>>, %arg2: memref<128x32xbf16, #tpu.memory_space<vmem>>, %arg3: memref<1x32xf32, #tpu.memory_space<vmem>>, %arg4: memref<32x96xbf16, #tpu.memory_space<vmem>>, %arg5: memref<1x96xf32, #tpu.memory_space<vmem>>, %arg6: memref<32x96xbf16, #tpu.memory_space<vmem>>, %arg7: memref<1x96xf32, #tpu.memory_space<vmem>>, %arg8: memref<32x128xbf16, #tpu.memory_space<vmem>>, %arg9: memref<1x128xf32, #tpu.memory_space<vmem>>, %arg10: memref<1x1x128xf32, #tpu.memory_space<vmem>>, %arg11: memref<1x32xf32, #tpu.memory_space<vmem>>) attributes {dimension_semantics = [#tpu.dimension_semantics<arbitrary>], iteration_bounds = array<i64: 8>, scalar_prefetch = 1 : i64, scratch_operands = 0 : i64, tpu.core_type = #tpu.core_type<tc>, window_params = [{pipeline_mode = #tpu.pipeline_mode<synchronous>, transform_indices = @transform_0, window_bounds = array<i64: 128, 32>}, {pipeline_mode = #tpu.pipeline_mode<synchronous>, transform_indices = @transform_1, window_bounds = array<i64: 1, 32>}, {pipeline_mode = #tpu.pipeline_mode<synchronous>, transform_indices = @transform_2, window_bounds = array<i64: 32, 96>}, {pipeline_mode = #tpu.pipeline_mode<synchronous>, transform_indices = @transform_3, window_bounds = array<i64: 1, 96>}, {pipeline_mode = #tpu.pipeline_mode<synchronous>, transform_indices = @transform_4, window_bounds = array<i64: 32, 96>}, {pipeline_mode = #tpu.pipeline_mode<synchronous>, transform_indices = @transform_5, window_bounds = array<i64: 1, 96>}, {pipeline_mode = #tpu.pipeline_mode<synchronous>, transform_indices = @transform_6, window_bounds = array<i64: 32, 128>}, {pipeline_mode = #tpu.pipeline_mode<synchronous>, transform_indices = @transform_7, window_bounds = array<i64: 1, 128>}, {transform_indices = @transform_8, window_bounds = array<i64: 1, 1, 128>}, {pipeline_mode = #tpu.pipeline_mode<synchronous>, transform_indices = @transform_9, window_bounds = array<i64: 1, 32>}]} {
    %c0_i32 = arith.constant 0 : i32
    %0 = arith.cmpi eq, %arg0, %c0_i32 : i32
    %1 = arith.extui %0 : i1 to i32
    %c0_i32_0 = arith.constant 0 : i32
    %2 = arith.cmpi ne, %1, %c0_i32_0 : i32
    scf.if %2 {
      %c0_30 = arith.constant 0 : index
      %c0_31 = arith.constant 0 : index
      %70 = vector.load %arg3[%c0_30, %c0_31] : memref<1x32xf32, #tpu.memory_space<vmem>>, vector<1x32xf32>
      %c0_32 = arith.constant 0 : index
      %c0_33 = arith.constant 0 : index
      %71 = vector.load %arg11[%c0_32, %c0_33] : memref<1x32xf32, #tpu.memory_space<vmem>>, vector<1x32xf32>
      tpu.vector_store %arg11[%c0_32, %c0_33], %70 {strides = array<i32>} : memref<1x32xf32, #tpu.memory_space<vmem>>, vector<1x32xf32>,
    } else {
    }
    %3 = arith.index_cast %arg0 : i32 to index
    %4 = memref.load %arg1[%3] : memref<8xi32, #tpu.memory_space<smem>>
    %5 = tpu.iota {dimensions = array<i32: 1>} : vector<1x128xi32>
    %6 = vector.broadcast %4 : i32 to vector<1x128xi32>
    %7 = arith.cmpi eq, %5, %6 : vector<1x128xi32>
    %8 = arith.extui %7 : vector<1x128xi1> to vector<1x128xi32>
    %9 = arith.sitofp %8 : vector<1x128xi32> to vector<1x128xf32>
    %10 = arith.truncf %9 : vector<1x128xf32> to vector<1x128xbf16>
    %c0 = arith.constant 0 : index
    %c0_1 = arith.constant 0 : index
    %11 = vector.load %arg2[%c0, %c0_1] : memref<128x32xbf16, #tpu.memory_space<vmem>>, vector<128x32xbf16>
    %cst = arith.constant dense<0.000000e+00> : vector<1x32xf32>
    %12 = tpu.matmul %10, %11, %cst {dimension_numbers = #tpu.dot_dimension_numbers<[1], [0], [0], [1], [0, 0, 1, 1], [], []>} : vector<1x128xbf16>, vector<128x32xbf16>, vector<1x32xf32> -> vector<1x32xf32>
    %cst_2 = arith.constant 0.000000e+00 : f32
    %13 = vector.broadcast %cst_2 : f32 to vector<1x32xf32>
    %14 = arith.maximumf %12, %13 : vector<1x32xf32>
    %c0_3 = arith.constant 0 : index
    %c0_4 = arith.constant 0 : index
    %15 = vector.load %arg11[%c0_3, %c0_4] : memref<1x32xf32, #tpu.memory_space<vmem>>, vector<1x32xf32>
    %16 = arith.truncf %14 : vector<1x32xf32> to vector<1x32xbf16>
    %c0_5 = arith.constant 0 : index
    %c0_6 = arith.constant 0 : index
    %17 = vector.load %arg4[%c0_5, %c0_6] : memref<32x96xbf16, #tpu.memory_space<vmem>>, vector<32x96xbf16>
    %cst_7 = arith.constant dense<0.000000e+00> : vector<1x96xf32>
    %18 = tpu.matmul %16, %17, %cst_7 {dimension_numbers = #tpu.dot_dimension_numbers<[1], [0], [0], [1], [0, 0, 1, 1], [], []>} : vector<1x32xbf16>, vector<32x96xbf16>, vector<1x96xf32> -> vector<1x96xf32>
    %c0_8 = arith.constant 0 : index
    %c0_9 = arith.constant 0 : index
    %19 = vector.load %arg5[%c0_8, %c0_9] : memref<1x96xf32, #tpu.memory_space<vmem>>, vector<1x96xf32>
    %20 = arith.addf %18, %19 : vector<1x96xf32>
    %21 = arith.truncf %15 : vector<1x32xf32> to vector<1x32xbf16>
    %c0_10 = arith.constant 0 : index
    %c0_11 = arith.constant 0 : index
    %22 = vector.load %arg6[%c0_10, %c0_11] : memref<32x96xbf16, #tpu.memory_space<vmem>>, vector<32x96xbf16>
    %cst_12 = arith.constant dense<0.000000e+00> : vector<1x96xf32>
    %23 = tpu.matmul %21, %22, %cst_12 {dimension_numbers = #tpu.dot_dimension_numbers<[1], [0], [0], [1], [0, 0, 1, 1], [], []>} : vector<1x32xbf16>, vector<32x96xbf16>, vector<1x96xf32> -> vector<1x96xf32>
    %c0_13 = arith.constant 0 : index
    %c0_14 = arith.constant 0 : index
    %24 = vector.load %arg7[%c0_13, %c0_14] : memref<1x96xf32, #tpu.memory_space<vmem>>, vector<1x96xf32>
    %25 = arith.addf %23, %24 : vector<1x96xf32>
    %26 = vector.extract_strided_slice %20 {offsets = [0, 0], sizes = [1, 32], strides = [1, 1]} : vector<1x96xf32> to vector<1x32xf32>
    %27 = vector.extract_strided_slice %25 {offsets = [0, 0], sizes = [1, 32], strides = [1, 1]} : vector<1x96xf32> to vector<1x32xf32>
    %28 = arith.addf %26, %27 : vector<1x32xf32>
    %29 = arith.negf %28 : vector<1x32xf32>
    %30 = math.exp %29 : vector<1x32xf32>
    %cst_15 = arith.constant 1.000000e+00 : f32
    %31 = vector.broadcast %cst_15 : f32 to vector<1x32xf32>
    %32 = arith.addf %31, %30 : vector<1x32xf32>
    %33 = arith.divf %31, %32 : vector<1x32xf32>
    %34 = vector.extract_strided_slice %20 {offsets = [0, 32], sizes = [1, 32], strides = [1, 1]} : vector<1x96xf32> to vector<1x32xf32>
    %35 = vector.extract_strided_slice %25 {offsets = [0, 32], sizes = [1, 32], strides = [1, 1]} : vector<1x96xf32> to vector<1x32xf32>
    %36 = arith.addf %34, %35 : vector<1x32xf32>
    %37 = arith.negf %36 : vector<1x32xf32>
    %38 = math.exp %37 : vector<1x32xf32>
    %cst_16 = arith.constant 1.000000e+00 : f32
    %39 = vector.broadcast %cst_16 : f32 to vector<1x32xf32>
    %40 = arith.addf %39, %38 : vector<1x32xf32>
    %41 = arith.divf %39, %40 : vector<1x32xf32>
    %42 = vector.extract_strided_slice %20 {offsets = [0, 64], sizes = [1, 32], strides = [1, 1]} : vector<1x96xf32> to vector<1x32xf32>
    %43 = vector.extract_strided_slice %25 {offsets = [0, 64], sizes = [1, 32], strides = [1, 1]} : vector<1x96xf32> to vector<1x32xf32>
    %44 = arith.mulf %33, %43 : vector<1x32xf32>
    %45 = arith.addf %42, %44 : vector<1x32xf32>
    %46 = math.tanh %45 : vector<1x32xf32>
    %cst_17 = arith.constant 1.000000e+00 : f32
    %47 = vector.broadcast %cst_17 : f32 to vector<1x32xf32>
    %48 = arith.subf %47, %41 : vector<1x32xf32>
    %49 = arith.mulf %48, %46 : vector<1x32xf32>
    %50 = arith.mulf %41, %15 : vector<1x32xf32>
    %51 = arith.addf %49, %50 : vector<1x32xf32>
    %c0_18 = arith.constant 0 : index
    %c0_19 = arith.constant 0 : index
    %52 = vector.load %arg11[%c0_18, %c0_19] : memref<1x32xf32, #tpu.memory_space<vmem>>, vector<1x32xf32>
    tpu.vector_store %arg11[%c0_18, %c0_19], %51 {strides = array<i32>} : memref<1x32xf32, #tpu.memory_space<vmem>>, vector<1x32xf32>,
    %53 = arith.truncf %51 : vector<1x32xf32> to vector<1x32xbf16>
    %c0_20 = arith.constant 0 : index
    %c0_21 = arith.constant 0 : index
    %54 = vector.load %arg8[%c0_20, %c0_21] : memref<32x128xbf16, #tpu.memory_space<vmem>>, vector<32x128xbf16>
    %cst_22 = arith.constant dense<0.000000e+00> : vector<1x128xf32>
    %55 = tpu.matmul %53, %54, %cst_22 {dimension_numbers = #tpu.dot_dimension_numbers<[1], [0], [0], [1], [0, 0, 1, 1], [], []>} : vector<1x32xbf16>, vector<32x128xbf16>, vector<1x128xf32> -> vector<1x128xf32>
    %c0_23 = arith.constant 0 : index
    %c0_24 = arith.constant 0 : index
    %56 = vector.load %arg9[%c0_23, %c0_24] : memref<1x128xf32, #tpu.memory_space<vmem>>, vector<1x128xf32>
    %57 = arith.addf %55, %56 : vector<1x128xf32>
    %cst_25 = arith.constant dense<0xFF800000> : vector<1xf32>
    %58 = vector.multi_reduction <maximumf>, %57, %cst_25 [1] : vector<1x128xf32> to vector<1xf32>
    %59 = vector.shape_cast %58 : vector<1xf32> to vector<1x1xf32>
    %60 = vector.broadcast %59 : vector<1x1xf32> to vector<1x128xf32>
    %61 = arith.subf %57, %60 : vector<1x128xf32>
    %62 = math.exp %61 : vector<1x128xf32>
    %cst_26 = arith.constant dense<0.000000e+00> : vector<1xf32>
    %63 = vector.multi_reduction <add>, %62, %cst_26 [1] : vector<1x128xf32> to vector<1xf32>
    %64 = vector.shape_cast %63 : vector<1xf32> to vector<1x1xf32>
    %65 = math.log %64 : vector<1x1xf32>
    %66 = vector.broadcast %65 : vector<1x1xf32> to vector<1x128xf32>
    %67 = arith.subf %61, %66 : vector<1x128xf32>
    %68 = vector.shape_cast %67 : vector<1x128xf32> to vector<1x1x128xf32>
    %c0_27 = arith.constant 0 : index
    %c0_28 = arith.constant 0 : index
    %c0_29 = arith.constant 0 : index
    %69 = vector.load %arg10[%c0_27, %c0_28, %c0_29] : memref<1x1x128xf32, #tpu.memory_space<vmem>>, vector<1x1x128xf32>
    tpu.vector_store %arg10[%c0_27, %c0_28, %c0_29], %68 {strides = array<i32>} : memref<1x1x128xf32, #tpu.memory_space<vmem>>, vector<1x1x128xf32>,
    return
  }
  func.func @transform_0(%arg0: i32, %arg1: memref<8xi32, #tpu.memory_space<smem>>) -> (i32, i32) {
    %c0_i32 = arith.constant 0 : i32
    %c0_i32_0 = arith.constant 0 : i32
    %c0_i32_1 = arith.constant 0 : i32
    return %c0_i32, %c0_i32_0 : i32, i32
  }
  func.func @transform_1(%arg0: i32, %arg1: memref<8xi32, #tpu.memory_space<smem>>) -> (i32, i32) {
    %c0_i32 = arith.constant 0 : i32
    %c0_i32_0 = arith.constant 0 : i32
    %c0_i32_1 = arith.constant 0 : i32
    return %c0_i32, %c0_i32_0 : i32, i32
  }
  func.func @transform_2(%arg0: i32, %arg1: memref<8xi32, #tpu.memory_space<smem>>) -> (i32, i32) {
    %c0_i32 = arith.constant 0 : i32
    %c0_i32_0 = arith.constant 0 : i32
    %c0_i32_1 = arith.constant 0 : i32
    return %c0_i32, %c0_i32_0 : i32, i32
  }
  func.func @transform_3(%arg0: i32, %arg1: memref<8xi32, #tpu.memory_space<smem>>) -> (i32, i32) {
    %c0_i32 = arith.constant 0 : i32
    %c0_i32_0 = arith.constant 0 : i32
    %c0_i32_1 = arith.constant 0 : i32
    return %c0_i32, %c0_i32_0 : i32, i32
  }
  func.func @transform_4(%arg0: i32, %arg1: memref<8xi32, #tpu.memory_space<smem>>) -> (i32, i32) {
    %c0_i32 = arith.constant 0 : i32
    %c0_i32_0 = arith.constant 0 : i32
    %c0_i32_1 = arith.constant 0 : i32
    return %c0_i32, %c0_i32_0 : i32, i32
  }
  func.func @transform_5(%arg0: i32, %arg1: memref<8xi32, #tpu.memory_space<smem>>) -> (i32, i32) {
    %c0_i32 = arith.constant 0 : i32
    %c0_i32_0 = arith.constant 0 : i32
    %c0_i32_1 = arith.constant 0 : i32
    return %c0_i32, %c0_i32_0 : i32, i32
  }
  func.func @transform_6(%arg0: i32, %arg1: memref<8xi32, #tpu.memory_space<smem>>) -> (i32, i32) {
    %c0_i32 = arith.constant 0 : i32
    %c0_i32_0 = arith.constant 0 : i32
    %c0_i32_1 = arith.constant 0 : i32
    return %c0_i32, %c0_i32_0 : i32, i32
  }
  func.func @transform_7(%arg0: i32, %arg1: memref<8xi32, #tpu.memory_space<smem>>) -> (i32, i32) {
    %c0_i32 = arith.constant 0 : i32
    %c0_i32_0 = arith.constant 0 : i32
    %c0_i32_1 = arith.constant 0 : i32
    return %c0_i32, %c0_i32_0 : i32, i32
  }
  func.func @transform_8(%arg0: i32, %arg1: memref<8xi32, #tpu.memory_space<smem>>) -> (i32, i32, i32) {
    %c0_i32 = arith.constant 0 : i32
    %c0_i32_0 = arith.constant 0 : i32
    %c0_i32_1 = arith.constant 0 : i32
    return %arg0, %c0_i32, %c0_i32_0 : i32, i32, i32
  }
  func.func @transform_9(%arg0: i32, %arg1: memref<8xi32, #tpu.memory_space<smem>>) -> (i32, i32) {
    %c0_i32 = arith.constant 0 : i32
    %c0_i32_0 = arith.constant 0 : i32
    %c0_i32_1 = arith.constant 0 : i32
    return %c0_i32, %c0_i32_0 : i32, i32
  }
}

</mosaic_0001>

<bundles_post_ra>
// kernel: tpu_custom_call.1
= control target key start
LH: loop header
LB: loop body
LE: loop exit
PB: predicated region body
PF: predicated region fallthrough
CT: control target
= control target key end

     0   :  { %s920_s16 = smov [#allocation3]   ;;  %s1144_s0 = inlined_call_operand.vmem [shape: s32[8], index: 0, kind: input, shape index: {}]   ;;  %s1145_s1 = inlined_call_operand.vmem [shape: bf16[128,32], index: 1, kind: input, shape index: {}]   ;;  %s1146_s2 = inlined_call_operand.vmem [shape: f32[1,32], index: 2, kind: input, shape index: {}]   ;;  %s1147_s3 = inlined_call_operand.vmem [shape: bf16[32,96], index: 3, kind: input, shape index: {}]   ;;  %s1148_s4 = inlined_call_operand.vmem [shape: f32[1,96], index: 4, kind: input, shape index: {}]   ;;  %s1149_s5 = inlined_call_operand.vmem [shape: bf16[32,96], index: 5, kind: input, shape index: {}]   ;;  %s1150_s6 = inlined_call_operand.vmem [shape: f32[1,96], index: 6, kind: input, shape index: {}]   ;;  %s1151_s7 = inlined_call_operand.vmem [shape: bf16[32,128], index: 7, kind: input, shape index: {}]   ;;  %s1152_s8 = inlined_call_operand.vmem [shape: f32[1,128], index: 8, kind: input, shape index: {}]   ;;  %s1153_s9 = inlined_call_operand.hbm [shape: f32[8,1,128], index: 9, kind: output, shape index: {0}]   ;;  %s1154_s10 = inlined_call_operand.hbm [shape: f32[1,32], index: 10, kind: output, shape index: {1}]  }
   0x1   :  { %s17_s15 = sshll.u32 %s1144_s0, 4  ;;  %s18_s15 = int_to_ptr.vmem [resolvable:$true] %s17_s15 }
   0x2   :  { %20 = dma.vmem_to_smem %s18_s15, 16, %s920_s16, [#allocation2] }
   0x3   :  { %894 = dma.done.wait [#allocation2], 16 }
   0x4   :  { %895 = vsyncadd [#allocation2], 4294967280 }
   0x5   :  { %23 = sfence }
   0x6   :  { %24 = vsyncpa [#allocation5], 0 }
   0x7   :  { %26 = vsyncpa [#allocation5 + $0x1], 0 }
   0x8   :  { %27 = vsyncpa [#allocation7], 0  ;;  %s984_s17 = smov 0   ;;  %s986_s18 = smov 0  }
   0x9   :  { %s988_s19 = smov 0   ;;  %s990_s20 = smov 0  }
   0xa LB: > { %s1005_s0 = sadd.s32 4294967295, %s918_s20   ;;  %s663_s21 = sadd.s32 4294967294, %s918_s20   ;;  %s918_s20 = sphi %s990_s20, %s1160_s20   ;;  %s914_s19 = sphi %s988_s19, %s1159_s19   ;;  %s910_s18 = sphi %s986_s18, %s1158_s18   ;;  %s906_s17 = sphi %s984_s17, %s1157_s17  }
   0xb   : > { %s1009_s22 = sadd.s32 1, %s918_s20   ;;  %s208_s23 = sadd.s32 1, %s914_s19 }
   0xc   : > { %s205_s24 = ssub.s32 %s918_s20, %s1009_s22  ;;  %p218_p0 = scmp.ne.s32.totalorder %s914_s19, %s910_s18 }
   0xd   : > { %p206_p1 = scmp.eq.s32.totalorder %s205_s24, 0  ;;  %p219_p2 = scmp.eq.s32.totalorder %s1005_s0, 7 }
   0xe   : > { %p224_p3 = scmp.ne.s32.totalorder %s910_s18, %s906_s17  ;;  %p225_p4 = scmp.eq.s32.totalorder %s663_s21, 7 }
   0xf   : > { %s1020_s25 = scalar_select %p206_p1, %s914_s19, %s208_s23  }
  0x10   : > { %p1024_p5 = por %p219_p2, %p218_p0  ;;  %p1028_p6 = por %p225_p4, %p224_p3 }
  0x11   : > { %p665_p7 = scmp.ge.s32.totalorder %s918_s20, 1  ;;  %p288_p8 = scmp.lt.s32.totalorder %s918_s20, 9 }
  0x13   : > { %p289_p9 = pnand %p665_p7, %p288_p8 }
  0x14   : > { %s314_s28 = sand.u32 (!%p289_p9), 1, %s910_s18   ;;  %p666_p10 = scmp.ne.s32.totalorder (!%p289_p9), %s1005_s0, 0 }
  0x15   : > { %292 = sbr.rel (%p289_p9) target bundleno = 1094 (0x446), region = 52  ;;  %s1037_s29 = scalar_lea.vmem (!%p289_p9), [#allocation4], %s314_s28 }
  0x1a   : > { %322 = sbr.rel (%p666_p10) target bundleno = 33 (0x21), region = 56 }
  0x1f   : > { %v323_v0 = vld [vmem:[%s1146_s2] sm:$0x1]  ;;  %vm324_vm0 = vcmask 253952  }
  0x20   : > { %325 = vst.msk [vmem:[#allocation6] sm:$0x1] %vm324_vm0, %v323_v0 }
  0x21 PF: > { %v741_v1 = vld [vmem:[%s1145_s1 + $0x38] sm:$0xff]  ;;  %v740_v2 = vld [vmem:[%s1145_s1 + $0x30] sm:$0xff]  ;;  %v745_v3 = vld [vmem:[%s1149_s5 + $0x8] sm:$0xff]  ;;  %vm431_vm1 = vcmask 261120   ;;  %s326_s23 = sld [smem:[#allocation3 + %s1005_s0]]  ;;  %v327_v12 = vlaneseq  ;;  %s923_s12 = smov 96  }
  0x22   : > { %398 = vmatpush.bf16.msra.mxu0 %v741_v1  ;;  %v743_v4 = vld [vmem:[%s1147_s3 + $0x8] sm:$0xff]  ;;  %475 = vmatpush.bf16.msra.mxu2 %v745_v3  ;;  %v744_v5 = vld [vmem:[%s1149_s5] sm:$0xff]  ;;  %v737_v10 = vld [vmem:[%s1145_s1 + $0x18] sm:$0xff]  ;;  %v921_v17 = vmov 1.0|1.0   ;;  %s924_s13 = smov 32   ;;  %s592_s21 = scalar_lea.hbm %s1153_s9, %s1005_s0 }
  0x23   : > { %441 = vmatpush.bf16.msra.mxu1 %v743_v4  ;;  %v739_v7 = vld [vmem:[%s1145_s1 + $0x28] sm:$0xff]  ;;  %v738_v9 = vld [vmem:[%s1145_s1 + $0x20] sm:$0xff]  ;;  %v736_v11 = vld [vmem:[%s1145_s1 + $0x10] sm:$0xff]  ;;  %v328_v14 = vand.u32 127, %v327_v12  ;;  %vm530_vm8 = vcmask 253952   ;;  %vm569_vm9 = vcmask 1040384  }
  0x24   : > { %v735_v13 = vld [vmem:[%s1145_s1 + $0x8] sm:$0xff]  ;;  %v734_v16 = vld [vmem:[%s1145_s1] sm:$0xff]  ;;  %s925_s30 = smov [#allocation6]   ;;  %s608_s14 = sshll.u32 %s1154_s10, 4  ;;  %s609_s14 = int_to_ptr.hbm [resolvable:$true] %s608_s14 }
  0x25   : > { %v742_v18 = vld [vmem:[%s1147_s3] sm:$0xff]  ;;  %v747_v51 = vld [vmem:[%s1151_s7 + $0x8] sm:$0xff]  ;;  %s606_s11 = sshll.u32 %s925_s30, 4  ;;  %s594_s24 = sshll.u32 %s1037_s29, 4  ;;  %s607_s11 = int_to_ptr.vmem [resolvable:$true] %s606_s11  ;;  %s595_s24 = int_to_ptr.vmem [resolvable:$true] %s594_s24 }
  0x26   : > { %399 = vmatpush.bf16.msra.mxu0 %v740_v2  ;;  %476 = vmatpush.bf16.msra.mxu2 %v744_v5  ;;  %v453_v19 = vld [vmem:[%s1150_s6] sm:$0x1]  ;;  %s584_s30 = scalar_lea.sflag [#allocation5], %s314_s28  ;;  %s870_s15 = scalar_lea.hbm %s1153_s9, 8 }
  0x27   : > { %v412_v6 = vld [vmem:[#allocation6] sm:$0x1]  ;;  %v329_v15 = vstv %s326_s23  ;;  %442 = vmatpush.bf16.msra.mxu1 %v742_v18  ;;  %s922_s23 = smov 64   ;;  %v418_v27 = vld [vmem:[%s1148_s4] sm:$0x1]  ;;  %562 = vmatpush.bf16.msra.mxu3 %v747_v51 }
  0x28   : > { %v448_v8 = vpack.c.bf16 %v412_v6, %v412_v6  ;;  %vm330_vm2 = vcmp.eq.s32.totalorder %v328_v14, %v329_v15  ;;  %v799_v50 = vld [vmem:[#allocation6] ss:$0 sm:$0xff]  ;;  %v537_v62 = vld [vmem:[%s1152_s8] sm:$0x1] }
  0x29   : > { %vm700_vm3 = vmpackc.low %vm330_vm2, %vm330_vm2  ;;  %v746_v52 = vld [vmem:[%s1151_s7] sm:$0xff] }
  0x2a   : > { %400 = vmatpush.bf16.msra.mxu0 %v739_v7  ;;  %719 = vmatmul.msk.bf16.vlgmr.msra.gmra.mxu2 %vm431_vm1, %v448_v8 }
  0x2b   : > { %563 = vmatpush.bf16.msra.mxu3 %v746_v52 }
  0x2e   : > { %401 = vmatpush.bf16.msra.mxu0 %v738_v9 }
  0x32   : > { %402 = vmatpush.bf16.msra.mxu0 %v737_v10 }
  0x36   : > { %403 = vmatpush.bf16.msra.mxu0 %v736_v11 }
  0x3a   : > { %404 = vmatpush.bf16.msra.mxu0 %v735_v13 }
  0x3e   : > { %405 = vmatpush.bf16.msra.mxu0 %v734_v16 }
  0x41   : > { %701 = vmatmul.msk.bf16.vlgmr.msra.gmra.mxu0 %vm700_vm3, %v921_v17 }
  0xad   : > { %v478_v20 = vpop.f32.mrf.mxu2 }
  0xae   : > { %v479_v21 = vadd.f32 %v478_v20, %v453_v19 }
  0xb0   : > { %503 = vrot.lane.b32.xlu0 %v479_v21, %s922_s23 }
  0xb5   : > { %v480_v22 = vpop.f32.mrf.mxu2 }
  0xbe   : > { %v407_v23 = vpop.f32.mrf.mxu0 }
  0xbf   : > { %v411_v24 = vmax.f32 %v407_v23, 0.0 }
  0xc1   : > { %v413_v25 = vpack.c.bf16 %v411_v24, %v411_v24 }
  0xc3   : > { %710 = vmatmul.msk.bf16.vlgmr.msra.gmra.mxu1 %vm431_vm1, %v413_v25 }
  0xc6   : > { %v409_v26 = vpop.f32.mrf.mxu0 }
 0x122   : > { %v504_v42 = vpop.permute.xlu0 %503 }
 0x140   : > { %v444_v28 = vpop.f32.mrf.mxu1 }
 0x141   : > { %v445_v29 = vadd.f32 %v444_v28, %v418_v27 }
 0x143   : > { %v482_v30 = vadd.f32 %v479_v21, %v445_v29 }
 0x145   : > { %v720_v31 = vmul.f32 -1.442695, %v482_v30 }
 0x147   : > { %800 = vpow2.f32 %v720_v31 }
 0x148   : > { %v446_v32 = vpop.f32.mrf.mxu1 }
 0x14d   : > { %v801_v33 = vpop.eup %800 }
 0x14e   : > { %v486_v34 = vadd.f32 1.0, %v801_v33 }
 0x150   : > { %802 = vrcp.f32 %v486_v34  ;;  %v498_v38 = vand.u32 2147483648, %v486_v34  ;;  %v496_v40 = vand.u32 2147483647, %v486_v34  ;;  %vm492_vm5 = vweird.f32 %v486_v34 }
 0x152   : > { %v499_v43 = vor.u32 1.1754944e-38, %v498_v38  ;;  %vm497_vm7 = vcmp.eq.f32.partialorder %v496_v40, 8.507059e+37 }
 0x156   : > { %v803_v35 = vpop.eup %802 }
 0x157   : > { %v488_v36 = vmul.f32 %v803_v35, %v486_v34  ;;  %vm493_vm4 = vweird.f32 %v803_v35 }
 0x158   : > { %vm494_vm6 = vmor %vm492_vm5, %vm493_vm4 }
 0x159   : > { %v489_v37 = vsub.f32 1.0, %v488_v36 }
 0x15b   : > { %v490_v39 = vmul.f32 %v803_v35, %v489_v37 }
 0x15d   : > { %v491_v41 = vadd.f32 %v803_v35, %v490_v39 }
 0x15f   : > { %v495_v44 = vsel %vm494_vm6, %v803_v35, %v491_v41 }
 0x160   : > { %v500_v45 = vsel %vm497_vm7, %v499_v43, %v495_v44 }
 0x161   : > { %v506_v46 = vmul.f32 %v504_v42, %v500_v45  ;;  %v513_v54 = vsub.f32 1.0, %v500_v45 }
 0x163   : > { %508 = vrot.lane.b32.xlu0 %v506_v46, %s922_s23  ;;  %s596_s23 = sshll.u32 %s592_s21, 4  ;;  %s597_s23 = int_to_ptr.hbm [resolvable:$true] %s596_s23 }
 0x1d5   : > { %v509_v47 = vpop.permute.xlu0 %508 }
 0x1d6   : > { %v511_v48 = vadd.f32 %v509_v47, %v445_v29 }
 0x1d8   : > { %804 = vtanh.f32 %v511_v48 }
 0x1de   : > { %v805_v49 = vpop.eup %804 }
 0x1df   : > { %515 = vrot.lane.b32.xlu1 %v805_v49, %s923_s12 }
 0x1e7   : > { %521 = vrot.lane.b32.xlu1 %v799_v50, %s924_s13 }
 0x251   : > { %v516_v53 = vpop.permute.xlu1 %515 }
 0x252   : > { %v518_v56 = vmul.f32 %v516_v53, %v513_v54 }
 0x259   : > { %v522_v55 = vpop.permute.xlu1 %521 }
 0x25a   : > { %v524_v57 = vmul.f32 %v522_v55, %v500_v45 }
 0x25c   : > { %v525_v58 = vadd.f32 %v524_v57, %v518_v56 }
 0x25e   : > { %527 = vrot.lane.b32.xlu1 %v525_v58, %s923_s12  ;;  %v532_v59 = vpack.c.bf16 %v525_v58, %v525_v58 }
 0x260   : > { %539 = vrot.lane.b32.xlu2 %v532_v59, %s923_s12  ;;  %s864_s12 = sshra.s32 %s597_s23, 4  ;;  %s865_s12 = int_to_ptr.hbm [resolvable:$true] %s864_s12 }
 0x261   : > { %p871_p0 = scmp.lt.s32.totalorder %s865_s12, %s1153_s9 }
 0x2ba   : > { %v540_v60 = vpop.permute.xlu2 %539 }
 0x2bb   : > { %729 = vmatmul.msk.bf16.vlgmr.msra.gmra.mxu3 %vm431_vm1, %v540_v60 }
 0x2d0   : > { %v528_v61 = vpop.permute.xlu1 %527 }
 0x2d1   : > { %531 = vst.msk [vmem:[#allocation6] sm:$0x1] %vm530_vm8, %v528_v61 }
 0x2d2   : > { %750 = dma.vmem_to_hbm [thread:$0]  (%p219_p2), %s607_s11, 16, %s609_s14, [#allocation7]  }
 0x2d3   : > { %s866_s11 = scalar_lea.hbm %s865_s12, 1 }
 0x2d4   : > { %p867_p11 = scmp.ne.s32.totalorder %s865_s12, %s866_s11  ;;  %p872_p1 = scmp.lt.s32.totalorder %s870_s15, %s866_s11 }
 0x2d6   : > { %p868_p12 = pnand %p867_p11, %p1024_p5  ;;  %p873_p3 = por %p872_p1, %p871_p0 }
 0x2d8   : > { %p869_p13 = pneg %p868_p12 }
 0x2da   : > { %p874_p4 = pnand %p873_p3, %p869_p13 }
 0x33e   : > { %v565_v63 = vpop.f32.mrf.mxu3 }
 0x33f   : > { %v566_v0 = vadd.f32 %v565_v63, %v537_v62 }
 0x341   : > { %v570_v1 = vsel %vm569_vm9, %v566_v0, -inf }
 0x342   : > { %571 = vmax.xlane.f32.xlu2 %v570_v1 }
 0x346   : > { %v567_v2 = vpop.f32.mrf.mxu3 }
 0x3b5   : > { %v572_v3 = vpop.xlane.xlu2 %571 }
 0x3b6   : > { %v573_v4 = vsub.f32 %v566_v0, %v572_v3 }
 0x3b8   : > { %v574_v5 = vmul.f32 1.442695, %v573_v4 }
 0x3ba   : > { %806 = vpow2.f32 %v574_v5 }
 0x3c0   : > { %v807_v6 = vpop.eup %806 }
 0x3c1   : > { %v576_v7 = vsel %vm569_vm9, %v807_v6, 0.0 }
 0x3c2   : > { %577 = vadd.xlane.f32.xlu0 %v576_v7 }
 0x435   : > { %v578_v8 = vpop.xlane.xlu0 %577 }
 0x436   : > { %808 = vlog2.f32 %v578_v8 }
 0x43c   : > { %v809_v9 = vpop.eup %808 }
 0x43d   : > { %v580_v10 = vmul.f32 0.6931472, %v809_v9 }
 0x43f   : > { %v581_v11 = vsub.f32 %v573_v4, %v580_v10 }
 0x441   : > { %582 = vst [vmem:[%s1037_s29] sm:$0x1] %v581_v11 }
 0x442   : > { %877 = shalt.err (!%p874_p4)
}
 0x443   : > { %748 = dma.vmem_to_hbm [thread:$0]  (%p1024_p5), %s595_s24, 16, %s597_s23, %s584_s30  }
 0x444   : > { %897 = dma.done.wait (%p219_p2), [#allocation7], 16  }
 0x445   : > { %899 = vsyncadd (%p219_p2), [#allocation7], 4294967280 }
 0x446 PF: > { %p760_p7 = scmp.ge.s32.totalorder %s918_s20, 2  ;;  %s625_s28 = sand.u32 1, %s906_s17  }
 0x447   : > { %s626_s29 = scalar_lea.sflag [#allocation5], %s625_s28 }
 0x448   : > { %p755_p8 = pnand %p760_p7, %p1028_p6 }
 0x44a   : > { %p756_p9 = pneg %p755_p8 }
 0x44c   : > { %901 = dma.done.wait (%p756_p9), %s626_s29, 16  }
 0x44d   : > { %903 = vsyncadd (%p756_p9), %s626_s29, 4294967280  ;;  %p30_p5 = scmp.ge.s32.totalorder %s1009_s22, 10   ;;  %s1157_s17 = smov %s910_s18 }
 0x44e   : > { %s1158_s18 = smov %s914_s19  ;;  %s1159_s19 = smov %s1020_s25 }
 0x44f   : > { %s1160_s20 = smov %s1009_s22  ;;  %32 = sbr.rel (!%p30_p5) target bundleno = 10 (0xa), region = 96 }
 0x454   :  { %631 = vsyncpa [#allocation5], 1 }
 0x455   :  { %633 = vsyncpa [#allocation5 + $0x1], 1 }
 0x456   :  { %634 = vsyncpa [#allocation7], 1 }

</bundles_post_ra>
